<compile_context>
chip_gen: v7x
topology: tpu7x:2x2x1
jax: 0.10.0
libtpu: 0.0.40
codegen_flags: <defaults>
</compile_context>

<pallas_src>
import jax
import jax.numpy as jnp
import numpy as np
from jax import lax
from jax.experimental import pallas as pl
from jax.experimental.pallas import tpu as pltpu


def _scdown_kernel(x_ref, above_ref, below_ref, w_ref, b_ref, o_ref):
    # x_ref:     (1, S, 2, Wp, 2*Cin) f32  -- S pooled rows of this strip, 2x2 windows pre-grouped
    # above_ref: (1, 1, 2, Wp, 2*Cin) f32  -- pooled-row halo above the strip (zeroed at s == 0)
    # below_ref: (1, 1, 2, Wp, 2*Cin) f32  -- pooled-row halo below the strip (zeroed at last s)
    # w_ref:     (9*Cin, Cout)        bf16 -- im2col conv weight, BN scale and 1/4 folded in
    # b_ref:     (1, Cout)            f32  -- folded BN bias
    # o_ref:     (1, S, Wp, Cout)     f32  -- NHWC output strip
    S = x_ref.shape[1]
    Wp = x_ref.shape[3]
    Cin = x_ref.shape[4] // 2
    Cout = o_ref.shape[-1]

    s = pl.program_id(1)
    last = pl.num_programs(1) - 1

    def pool(win):  # (R, 2, Wp, 2*Cin) f32 -> (R, Wp, Cin); f32 VPU math, 1/4 folded into w_ref
        rows = win[:, 0] + win[:, 1]                 # sum over the 2 window rows
        return rows[:, :, :Cin] + rows[:, :, Cin:]   # sum over the 2 window cols

    pooled = pool(x_ref[0])                                    # (S, Wp, Cin)
    above = jnp.where(s == 0, 0.0, pool(above_ref[0]))         # (1, Wp, Cin), zero at image top
    below = jnp.where(s == last, 0.0, pool(below_ref[0]))      # (1, Wp, Cin), zero at image bottom

    # Pooled rows [-1 .. S] of this strip; axis 0 is a major axis, so this concat is cheap.
    padded = jnp.concatenate([above, pooled, below], axis=0)   # (S+2, Wp, Cin) f32

    # Width-direction conv taps via XLU rolls + edge masks on the sublane (Wp) axis.
    w_idx = lax.broadcasted_iota(jnp.int32, (1, Wp, 1), 1)
    left = jnp.where(w_idx == 0, 0.0, pltpu.roll(padded, 1, axis=1))            # value at w: padded[w-1]
    right = jnp.where(w_idx == Wp - 1, 0.0, pltpu.roll(padded, Wp - 1, axis=1))  # value at w: padded[w+1]
    shifts = (left.astype(jnp.bfloat16),      # kw = 0
              padded.astype(jnp.bfloat16),    # kw = 1
              right.astype(jnp.bfloat16))     # kw = 2

    # im2col patches built directly in bf16; kh-slices along the major axis are free.
    taps = [shifts[kw][kh:kh + S] for kh in range(3) for kw in range(3)]  # 9 x (S, Wp, Cin)
    patches = jnp.concatenate(taps, axis=-1).reshape(S * Wp, 9 * Cin)     # (S*Wp, 9*Cin) bf16

    acc = jnp.dot(patches, w_ref[...], preferred_element_type=jnp.float32)  # (S*Wp, Cout) f32
    y = acc + b_ref[...]                                                    # folded BN bias
    o_ref[0] = y.reshape(S, Wp, Cout).astype(o_ref.dtype)


def sc_down_block_nhwc(x_nhwc, weight_oihw, gamma, beta, running_mean, running_var, eps=1e-5):
    """ScDownBlock forward, NHWC in / NHWC out (TPU-native path, no wrapper relayout passes)."""
    N, H, W, Cin = x_nhwc.shape
    Cout = weight_oihw.shape[0]
    assert H % 2 == 0 and W % 2 == 0, "AvgPool2d(2,2) path assumes even H, W"
    Hp, Wp = H // 2, W // 2

    # 2x2 pooling windows exposed by a FREE contiguous reshape (no transpose pass).
    x5 = jnp.asarray(x_nhwc, jnp.float32).reshape(N, Hp, 2, Wp, 2 * Cin)

    # im2col weight (kh, kw, ci) x co with BN scale and the avg-pool 1/4 folded in (f32, then bf16).
    scale = gamma / jnp.sqrt(running_var + eps)
    w9 = jnp.transpose(weight_oihw, (2, 3, 1, 0)).reshape(9 * Cin, Cout)
    w9 = (w9 * (0.25 * scale)[None, :]).astype(jnp.bfloat16)
    bias = (beta - running_mean * scale).reshape(1, Cout).astype(jnp.float32)

    # ---- per-chip VMEM budget and row-strip height -------------------------------------------
    try:
        vmem_phys = int(pltpu.get_tpu_info().vmem_capacity_bytes)
    except Exception:
        vmem_phys = 64 * 1024 * 1024                 # conservative fallback (v7x-sized)
    vmem_limit = min((vmem_phys * 3) // 4, 96 * 1024 * 1024)   # 96 MiB on v5e/v6e, 48 MiB on v7x
    budget = (vmem_limit * 3) // 4

    def rup(a, b):
        return -(-a // b) * b

    def vmem_estimate(sh):
        f32b, bf16b = 4, 2
        wp8 = rup(Wp, 8)
        blk = (sh * 2 * wp8 * rup(2 * Cin, 128) * f32b          # main input strip
               + 2 * 2 * wp8 * rup(2 * Cin, 128) * f32b         # two 1-row halo blocks
               + sh * wp8 * rup(Cout, 128) * f32b               # output strip
               + rup(9 * Cin, 8) * rup(Cout, 128) * bf16b       # weight
               + 8 * rup(Cout, 128) * f32b)                     # bias
        m = sh * Wp
        tmp = (4 * (sh + 2) * wp8 * rup(Cin, 128) * f32b        # pooled + shifted variants (f32)
               + rup(m, 8) * rup(9 * Cin, 128) * bf16b          # bf16 patch matrix
               + rup(m, 8) * rup(Cout, 128) * f32b)             # f32 matmul accumulator
        return 2 * blk + tmp                                    # BlockSpec blocks double-buffered

    strip_h = Hp
    if Hp % 2 == 0 and Hp >= 2:
        strip_h = Hp // 2        # >= 2 strips/image: pipeline overlap + megacore work at N == 1
    while strip_h % 2 == 0 and vmem_estimate(strip_h) > budget:
        strip_h //= 2
    # TODO(synk): non-power-of-two strip factors / W-direction strips for extremely wide images.
    n_strips = Hp // strip_h

    out = pl.pallas_call(
        _scdown_kernel,
        out_shape=jax.ShapeDtypeStruct((N, Hp, Wp, Cout), jnp.float32),
        grid=(N, n_strips),
        in_specs=[
            pl.BlockSpec((1, strip_h, 2, Wp, 2 * Cin),
                         lambda n, s: (n, s, 0, 0, 0)),
            pl.BlockSpec((1, 1, 2, Wp, 2 * Cin),
                         lambda n, s: (n, jnp.maximum(s * strip_h - 1, 0), 0, 0, 0)),
            pl.BlockSpec((1, 1, 2, Wp, 2 * Cin),
                         lambda n, s: (n, jnp.minimum((s + 1) * strip_h, Hp - 1), 0, 0, 0)),
            pl.BlockSpec((9 * Cin, Cout), lambda n, s: (0, 0)),
            pl.BlockSpec((1, Cout), lambda n, s: (0, 0)),
        ],
        out_specs=pl.BlockSpec((1, strip_h, Wp, Cout), lambda n, s: (n, s, 0, 0)),
        compiler_params=pltpu.CompilerParams(
            dimension_semantics=("parallel", "parallel"),
            vmem_limit_bytes=int(vmem_limit)),
    )(x5, x5, x5, w9, bias)
    return out


def sc_down_block(x_nchw, weight_oihw, gamma, beta, running_mean, running_var, eps=1e-5):
    """PyTorch-layout compat shim (NCHW in / NCHW out).

    A native TPU pipeline would keep activations NHWC end-to-end and call
    sc_down_block_nhwc directly, avoiding these two boundary relayout passes.
    """
    x_nhwc = jnp.transpose(x_nchw, (0, 2, 3, 1))
    out_nhwc = sc_down_block_nhwc(x_nhwc, weight_oihw, gamma, beta,
                                  running_mean, running_var, eps)
    return jnp.transpose(out_nhwc, (0, 3, 1, 2))


def _reference(x, w, gamma, beta, mean, var, eps=1e-5):
    """Pure-JAX NCHW reference of the same forward pass."""
    xp = lax.reduce_window(x, 0.0, lax.add, (1, 1, 2, 2), (1, 1, 2, 2), "VALID") * 0.25
    y = lax.conv_general_dilated(xp, w, window_strides=(1, 1),
                                 padding=((1, 1), (1, 1)),
                                 dimension_numbers=("NCHW", "OIHW", "NCHW"))
    s = gamma / jnp.sqrt(var + eps)
    b = beta - mean * s
    return y * s[None, :, None, None] + b[None, :, None, None]


if __name__ == "__main__":
    N, Cin, Cout, H, W = 2, 4, 8, 16, 16

    key = jax.random.PRNGKey(0)
    kx, kw, kg, kb, km, kv = jax.random.split(key, 6)

    x = jax.random.normal(kx, (N, Cin, H, W), jnp.float32)
    weight = jax.random.normal(kw, (Cout, Cin, 3, 3), jnp.float32) * 0.1
    gamma = 1.0 + 0.1 * jax.random.normal(kg, (Cout,), jnp.float32)
    beta = 0.05 * jax.random.normal(kb, (Cout,), jnp.float32)
    running_mean = 0.1 * jax.random.normal(km, (Cout,), jnp.float32)
    running_var = 0.5 + jnp.abs(jax.random.normal(kv, (Cout,), jnp.float32)) * 0.5

    out = jax.block_until_ready(
        sc_down_block(x, weight, gamma, beta, running_mean, running_var))
    ref = jax.block_until_ready(
        _reference(x, weight, gamma, beta, running_mean, running_var))

    assert out.shape == (N, Cout, H // 2, W // 2)
    # bf16 MXU operands with f32 accumulation -> loosen tolerance vs the pure-f32 reference.
    np.testing.assert_allclose(np.asarray(out), np.asarray(ref), rtol=2e-2, atol=2e-2)

    print("KERNEL_OK")
</pallas_src>

<mosaic_0001>
module attributes {stable_mosaic.version = 11 : i64} {
  func.func @_scdown_kernel(%arg0: i32, %arg1: i32, %arg2: memref<1x4x2x8x8xf32, #tpu.memory_space<vmem>>, %arg3: memref<1x1x2x8x8xf32, #tpu.memory_space<vmem>>, %arg4: memref<1x1x2x8x8xf32, #tpu.memory_space<vmem>>, %arg5: memref<36x8xbf16, #tpu.memory_space<vmem>>, %arg6: memref<1x8xf32, #tpu.memory_space<vmem>>, %arg7: memref<1x4x8x8xf32, #tpu.memory_space<vmem>>) attributes {dimension_semantics = [#tpu.dimension_semantics<parallel>, #tpu.dimension_semantics<parallel>], iteration_bounds = array<i64: 2, 2>, scalar_prefetch = 0 : i64, scratch_operands = 0 : i64, tpu.core_type = #tpu.core_type<tc>, window_params = [{transform_indices = @transform_0, window_bounds = array<i64: 1, 4, 2, 8, 8>}, {transform_indices = @transform_1, window_bounds = array<i64: 1, 1, 2, 8, 8>}, {transform_indices = @transform_2, window_bounds = array<i64: 1, 1, 2, 8, 8>}, {pipeline_mode = #tpu.pipeline_mode<synchronous>, transform_indices = @transform_3, window_bounds = array<i64: 36, 8>}, {pipeline_mode = #tpu.pipeline_mode<synchronous>, transform_indices = @transform_4, window_bounds = array<i64: 1, 8>}, {transform_indices = @transform_5, window_bounds = array<i64: 1, 4, 8, 8>}]} {
    %c0 = arith.constant 0 : index
    %c0_0 = arith.constant 0 : index
    %c0_1 = arith.constant 0 : index
    %c0_2 = arith.constant 0 : index
    %c0_3 = arith.constant 0 : index
    %0 = vector.load %arg2[%c0, %c0_0, %c0_1, %c0_2, %c0_3] : memref<1x4x2x8x8xf32, #tpu.memory_space<vmem>>, vector<1x4x2x8x8xf32>
    %1 = vector.shape_cast %0 : vector<1x4x2x8x8xf32> to vector<4x2x8x8xf32>
    %2 = vector.extract_strided_slice %1 {offsets = [0, 0, 0, 0], sizes = [4, 1, 8, 8], strides = [1, 1, 1, 1]} : vector<4x2x8x8xf32> to vector<4x1x8x8xf32>
    %3 = vector.shape_cast %2 : vector<4x1x8x8xf32> to vector<4x8x8xf32>
    %4 = vector.extract_strided_slice %1 {offsets = [0, 1, 0, 0], sizes = [4, 1, 8, 8], strides = [1, 1, 1, 1]} : vector<4x2x8x8xf32> to vector<4x1x8x8xf32>
    %5 = vector.shape_cast %4 : vector<4x1x8x8xf32> to vector<4x8x8xf32>
    %6 = arith.addf %3, %5 : vector<4x8x8xf32>
    %7 = vector.extract_strided_slice %6 {offsets = [0, 0, 0], sizes = [4, 8, 4], strides = [1, 1, 1]} : vector<4x8x8xf32> to vector<4x8x4xf32>
    %8 = vector.extract_strided_slice %6 {offsets = [0, 0, 4], sizes = [4, 8, 4], strides = [1, 1, 1]} : vector<4x8x8xf32> to vector<4x8x4xf32>
    %9 = arith.addf %7, %8 : vector<4x8x4xf32>
    %c0_i32 = arith.constant 0 : i32
    %10 = arith.cmpi eq, %arg1, %c0_i32 : i32
    %c0_4 = arith.constant 0 : index
    %c0_5 = arith.constant 0 : index
    %c0_6 = arith.constant 0 : index
    %c0_7 = arith.constant 0 : index
    %c0_8 = arith.constant 0 : index
    %11 = vector.load %arg3[%c0_4, %c0_5, %c0_6, %c0_7, %c0_8] : memref<1x1x2x8x8xf32, #tpu.memory_space<vmem>>, vector<1x1x2x8x8xf32>
    %12 = vector.shape_cast %11 : vector<1x1x2x8x8xf32> to vector<1x2x8x8xf32>
    %13 = vector.extract_strided_slice %12 {offsets = [0, 0, 0, 0], sizes = [1, 1, 8, 8], strides = [1, 1, 1, 1]} : vector<1x2x8x8xf32> to vector<1x1x8x8xf32>
    %14 = vector.shape_cast %13 : vector<1x1x8x8xf32> to vector<1x8x8xf32>
    %15 = vector.extract_strided_slice %12 {offsets = [0, 1, 0, 0], sizes = [1, 1, 8, 8], strides = [1, 1, 1, 1]} : vector<1x2x8x8xf32> to vector<1x1x8x8xf32>
    %16 = vector.shape_cast %15 : vector<1x1x8x8xf32> to vector<1x8x8xf32>
    %17 = arith.addf %14, %16 : vector<1x8x8xf32>
    %18 = vector.extract_strided_slice %17 {offsets = [0, 0, 0], sizes = [1, 8, 4], strides = [1, 1, 1]} : vector<1x8x8xf32> to vector<1x8x4xf32>
    %19 = vector.extract_strided_slice %17 {offsets = [0, 0, 4], sizes = [1, 8, 4], strides = [1, 1, 1]} : vector<1x8x8xf32> to vector<1x8x4xf32>
    %20 = arith.addf %18, %19 : vector<1x8x4xf32>
    %cst = arith.constant 0.000000e+00 : f32
    %21 = vector.broadcast %cst : f32 to vector<1x8x4xf32>
    %22 = arith.select %10, %21, %20 : vector<1x8x4xf32>
    %c1_i32 = arith.constant 1 : i32
    %23 = arith.cmpi eq, %arg1, %c1_i32 : i32
    %c0_9 = arith.constant 0 : index
    %c0_10 = arith.constant 0 : index
    %c0_11 = arith.constant 0 : index
    %c0_12 = arith.constant 0 : index
    %c0_13 = arith.constant 0 : index
    %24 = vector.load %arg4[%c0_9, %c0_10, %c0_11, %c0_12, %c0_13] : memref<1x1x2x8x8xf32, #tpu.memory_space<vmem>>, vector<1x1x2x8x8xf32>
    %25 = vector.shape_cast %24 : vector<1x1x2x8x8xf32> to vector<1x2x8x8xf32>
    %26 = vector.extract_strided_slice %25 {offsets = [0, 0, 0, 0], sizes = [1, 1, 8, 8], strides = [1, 1, 1, 1]} : vector<1x2x8x8xf32> to vector<1x1x8x8xf32>
    %27 = vector.shape_cast %26 : vector<1x1x8x8xf32> to vector<1x8x8xf32>
    %28 = vector.extract_strided_slice %25 {offsets = [0, 1, 0, 0], sizes = [1, 1, 8, 8], strides = [1, 1, 1, 1]} : vector<1x2x8x8xf32> to vector<1x1x8x8xf32>
    %29 = vector.shape_cast %28 : vector<1x1x8x8xf32> to vector<1x8x8xf32>
    %30 = arith.addf %27, %29 : vector<1x8x8xf32>
    %31 = vector.extract_strided_slice %30 {offsets = [0, 0, 0], sizes = [1, 8, 4], strides = [1, 1, 1]} : vector<1x8x8xf32> to vector<1x8x4xf32>
    %32 = vector.extract_strided_slice %30 {offsets = [0, 0, 4], sizes = [1, 8, 4], strides = [1, 1, 1]} : vector<1x8x8xf32> to vector<1x8x4xf32>
    %33 = arith.addf %31, %32 : vector<1x8x4xf32>
    %cst_14 = arith.constant 0.000000e+00 : f32
    %34 = vector.broadcast %cst_14 : f32 to vector<1x8x4xf32>
    %35 = arith.select %23, %34, %33 : vector<1x8x4xf32>
    %36 = tpu.concatenate %22, %9, %35 in 0 : vector<1x8x4xf32>, vector<4x8x4xf32>, vector<1x8x4xf32> -> vector<6x8x4xf32>
    %37 = tpu.iota {dimensions = array<i32: 1>} : vector<1x8x1xi32>
    %c0_i32_15 = arith.constant 0 : i32
    %38 = vector.broadcast %c0_i32_15 : i32 to vector<1x8x1xi32>
    %39 = arith.cmpi eq, %37, %38 : vector<1x8x1xi32>
    %c1_i32_16 = arith.constant 1 : i32
    %40 = tpu.dynamic_rotate %36 by %c1_i32_16 dim 1 : vector<6x8x4xf32>, i32 -> vector<6x8x4xf32>
    %cst_17 = arith.constant 0.000000e+00 : f32
    %41 = vector.shape_cast %39 : vector<1x8x1xi1> to vector<1x8x1xi1>
    %42 = vector.broadcast %41 : vector<1x8x1xi1> to vector<6x8x4xi1>
    %43 = vector.broadcast %cst_17 : f32 to vector<6x8x4xf32>
    %44 = arith.select %42, %43, %40 : vector<6x8x4xi1>, vector<6x8x4xf32>
    %c7_i32 = arith.constant 7 : i32
    %45 = vector.broadcast %c7_i32 : i32 to vector<1x8x1xi32>
    %46 = arith.cmpi eq, %37, %45 : vector<1x8x1xi32>
    %c7_i32_18 = arith.constant 7 : i32
    %47 = tpu.dynamic_rotate %36 by %c7_i32_18 dim 1 : vector<6x8x4xf32>, i32 -> vector<6x8x4xf32>
    %cst_19 = arith.constant 0.000000e+00 : f32
    %48 = vector.shape_cast %46 : vector<1x8x1xi1> to vector<1x8x1xi1>
    %49 = vector.broadcast %48 : vector<1x8x1xi1> to vector<6x8x4xi1>
    %50 = vector.broadcast %cst_19 : f32 to vector<6x8x4xf32>
    %51 = arith.select %49, %50, %47 : vector<6x8x4xi1>, vector<6x8x4xf32>
    %52 = arith.truncf %44 : vector<6x8x4xf32> to vector<6x8x4xbf16>
    %53 = arith.truncf %36 : vector<6x8x4xf32> to vector<6x8x4xbf16>
    %54 = arith.truncf %51 : vector<6x8x4xf32> to vector<6x8x4xbf16>
    %55 = vector.extract_strided_slice %52 {offsets = [0, 0, 0], sizes = [4, 8, 4], strides = [1, 1, 1]} : vector<6x8x4xbf16> to vector<4x8x4xbf16>
    %56 = vector.extract_strided_slice %53 {offsets = [0, 0, 0], sizes = [4, 8, 4], strides = [1, 1, 1]} : vector<6x8x4xbf16> to vector<4x8x4xbf16>
    %57 = vector.extract_strided_slice %54 {offsets = [0, 0, 0], sizes = [4, 8, 4], strides = [1, 1, 1]} : vector<6x8x4xbf16> to vector<4x8x4xbf16>
    %58 = vector.extract_strided_slice %52 {offsets = [1, 0, 0], sizes = [4, 8, 4], strides = [1, 1, 1]} : vector<6x8x4xbf16> to vector<4x8x4xbf16>
    %59 = vector.extract_strided_slice %53 {offsets = [1, 0, 0], sizes = [4, 8, 4], strides = [1, 1, 1]} : vector<6x8x4xbf16> to vector<4x8x4xbf16>
    %60 = vector.extract_strided_slice %54 {offsets = [1, 0, 0], sizes = [4, 8, 4], strides = [1, 1, 1]} : vector<6x8x4xbf16> to vector<4x8x4xbf16>
    %61 = vector.extract_strided_slice %52 {offsets = [2, 0, 0], sizes = [4, 8, 4], strides = [1, 1, 1]} : vector<6x8x4xbf16> to vector<4x8x4xbf16>
    %62 = vector.extract_strided_slice %53 {offsets = [2, 0, 0], sizes = [4, 8, 4], strides = [1, 1, 1]} : vector<6x8x4xbf16> to vector<4x8x4xbf16>
    %63 = vector.extract_strided_slice %54 {offsets = [2, 0, 0], sizes = [4, 8, 4], strides = [1, 1, 1]} : vector<6x8x4xbf16> to vector<4x8x4xbf16>
    %64 = tpu.concatenate %55, %56, %57, %58, %59, %60, %61, %62, %63 in 2 : vector<4x8x4xbf16>, vector<4x8x4xbf16>, vector<4x8x4xbf16>, vector<4x8x4xbf16>, vector<4x8x4xbf16>, vector<4x8x4xbf16>, vector<4x8x4xbf16>, vector<4x8x4xbf16>, vector<4x8x4xbf16> -> vector<4x8x36xbf16>
    %65 = vector.shape_cast %64 : vector<4x8x36xbf16> to vector<32x36xbf16>
    %c0_20 = arith.constant 0 : index
    %c0_21 = arith.constant 0 : index
    %66 = vector.load %arg5[%c0_20, %c0_21] : memref<36x8xbf16, #tpu.memory_space<vmem>>, vector<36x8xbf16>
    %cst_22 = arith.constant dense<0.000000e+00> : vector<32x8xf32>
    %67 = tpu.matmul %65, %66, %cst_22 {dimension_numbers = #tpu.dot_dimension_numbers<[1], [0], [0], [1], [0, 0, 1, 1], [], []>} : vector<32x36xbf16>, vector<36x8xbf16>, vector<32x8xf32> -> vector<32x8xf32>
    %c0_23 = arith.constant 0 : index
    %c0_24 = arith.constant 0 : index
    %68 = vector.load %arg6[%c0_23, %c0_24] : memref<1x8xf32, #tpu.memory_space<vmem>>, vector<1x8xf32>
    %69 = vector.broadcast %68 : vector<1x8xf32> to vector<32x8xf32>
    %70 = arith.addf %67, %69 : vector<32x8xf32>
    %71 = vector.shape_cast %70 : vector<32x8xf32> to vector<4x8x8xf32>
    %c0_25 = arith.constant 0 : index
    %c0_26 = arith.constant 0 : index
    %c0_27 = arith.constant 0 : index
    %c0_28 = arith.constant 0 : index
    %72 = vector.load %arg7[%c0_25, %c0_26, %c0_27, %c0_28] : memref<1x4x8x8xf32, #tpu.memory_space<vmem>>, vector<1x4x8x8xf32>
    %73 = vector.shape_cast %72 : vector<1x4x8x8xf32> to vector<4x8x8xf32>
    %74 = vector.shape_cast %71 : vector<4x8x8xf32> to vector<1x4x8x8xf32>
    tpu.vector_store %arg7[%c0_25, %c0_26, %c0_27, %c0_28], %74 {strides = array<i32>} : memref<1x4x8x8xf32, #tpu.memory_space<vmem>>, vector<1x4x8x8xf32>,
    return
  }
  func.func @transform_0(%arg0: i32, %arg1: i32) -> (i32, i32, i32, i32, i32) {
    %c0_i32 = arith.constant 0 : i32
    %c0_i32_0 = arith.constant 0 : i32
    %c0_i32_1 = arith.constant 0 : i32
    %c0_i32_2 = arith.constant 0 : i32
    return %arg0, %arg1, %c0_i32, %c0_i32_0, %c0_i32_1 : i32, i32, i32, i32, i32
  }
  func.func @transform_1(%arg0: i32, %arg1: i32) -> (i32, i32, i32, i32, i32) {
    %c4_i32 = arith.constant 4 : i32
    %0 = arith.muli %arg1, %c4_i32 : i32
    %c1_i32 = arith.constant 1 : i32
    %1 = arith.subi %0, %c1_i32 : i32
    %c0_i32 = arith.constant 0 : i32
    %2 = arith.maxsi %1, %c0_i32 : i32
    %c0_i32_0 = arith.constant 0 : i32
    %c0_i32_1 = arith.constant 0 : i32
    %c0_i32_2 = arith.constant 0 : i32
    %c0_i32_3 = arith.constant 0 : i32
    return %arg0, %2, %c0_i32_0, %c0_i32_1, %c0_i32_2 : i32, i32, i32, i32, i32
  }
  func.func @transform_2(%arg0: i32, %arg1: i32) -> (i32, i32, i32, i32, i32) {
    %c1_i32 = arith.constant 1 : i32
    %0 = arith.addi %arg1, %c1_i32 : i32
    %c4_i32 = arith.constant 4 : i32
    %1 = arith.muli %0, %c4_i32 : i32
    %c7_i32 = arith.constant 7 : i32
    %2 = arith.minsi %1, %c7_i32 : i32
    %c0_i32 = arith.constant 0 : i32
    %c0_i32_0 = arith.constant 0 : i32
    %c0_i32_1 = arith.constant 0 : i32
    %c0_i32_2 = arith.constant 0 : i32
    return %arg0, %2, %c0_i32, %c0_i32_0, %c0_i32_1 : i32, i32, i32, i32, i32
  }
  func.func @transform_3(%arg0: i32, %arg1: i32) -> (i32, i32) {
    %c0_i32 = arith.constant 0 : i32
    %c0_i32_0 = arith.constant 0 : i32
    %c0_i32_1 = arith.constant 0 : i32
    return %c0_i32, %c0_i32_0 : i32, i32
  }
  func.func @transform_4(%arg0: i32, %arg1: i32) -> (i32, i32) {
    %c0_i32 = arith.constant 0 : i32
    %c0_i32_0 = arith.constant 0 : i32
    %c0_i32_1 = arith.constant 0 : i32
    return %c0_i32, %c0_i32_0 : i32, i32
  }
  func.func @transform_5(%arg0: i32, %arg1: i32) -> (i32, i32, i32, i32) {
    %c0_i32 = arith.constant 0 : i32
    %c0_i32_0 = arith.constant 0 : i32
    %c0_i32_1 = arith.constant 0 : i32
    return %arg0, %arg1, %c0_i32, %c0_i32_0 : i32, i32, i32, i32
  }
}

</mosaic_0001>

<bundles_post_ra>
// kernel: tpu_custom_call.1
= control target key start
LH: loop header
LB: loop body
LE: loop exit
PB: predicated region body
PF: predicated region fallthrough
CT: control target
= control target key end

     0   :  { %s1984_s0 = inlined_call_operand.hbm [shape: f32[2,8,2,8,8], index: 0, kind: input, shape index: {}]   ;;  %s1985_s1 = inlined_call_operand.hbm [shape: f32[2,8,2,8,8], index: 1, kind: input, shape index: {}]   ;;  %s1986_s2 = inlined_call_operand.hbm [shape: f32[2,8,2,8,8], index: 2, kind: input, shape index: {}]   ;;  %s1987_s3 = inlined_call_operand.vmem [shape: bf16[36,8], index: 3, kind: input, shape index: {}]   ;;  %s1988_s4 = inlined_call_operand.vmem [shape: f32[1,8], index: 4, kind: input, shape index: {}]   ;;  %s1989_s5 = inlined_call_operand.hbm [shape: f32[2,8,8,8], index: 5, kind: output, shape index: {}]  }
   0x1   :  { %2014 = sst [smem:[#allocation25_spill]] %s1984_s0 }
   0x2   :  { %2015 = sst [smem:[#allocation26_spill]] %s1985_s1 }
   0x3   :  { %2016 = sst [smem:[#allocation27_spill]] %s1986_s2 }
   0x4   :  { %2017 = sst [smem:[#allocation28_spill]] %s1987_s3 }
   0x5   :  { %2018 = sst [smem:[#allocation29_spill]] %s1988_s4 }
   0x6   :  { %2019 = sst [smem:[#allocation30_spill]] %s1989_s5 }
   0x7   :  { %10 = vsyncpa [#allocation3], 0 }
   0x8   :  { %12 = vsyncpa [#allocation3 + $0x1], 0 }
   0x9   :  { %13 = vsyncpa [#allocation6], 0 }
   0xa   :  { %15 = vsyncpa [#allocation6 + $0x1], 0 }
   0xb   :  { %16 = vsyncpa [#allocation4], 0 }
   0xc   :  { %18 = vsyncpa [#allocation4 + $0x1], 0  ;;  %s1414_s18 = smov 0   ;;  %s1416_s19 = smov 0  }
   0xd   :  { %s1418_s20 = smov 0   ;;  %s1420_s21 = smov 0  }
   0xe   :  { %s1422_s22 = smov 0   ;;  %s1424_s23 = smov 0  }
   0xf   :  { %s1426_s24 = smov 0   ;;  %s1428_s25 = smov 0  }
  0x10   :  { %s1430_s26 = smov 0   ;;  %s1432_s27 = smov 0  }
  0x11   :  { %s1434_s28 = smov 0   ;;  %s1436_s29 = smov 0  }
  0x12   :  { %s1438_s30 = smov 0   ;;  %s1440_s6 = smov 0  }
  0x13 LB: > { %2020 = sst [smem:[#allocation13_spill]] %s1330_s22  ;;  %s1485_s7 = sadd.s32 4294967295, %s1366_s6   ;;  %s1366_s6 = sphi %s1440_s6, %s24_s6   ;;  %s1362_s30 = sphi %s1438_s30, %s2082_s30   ;;  %s1358_s29 = sphi %s1436_s29, %s2081_s29   ;;  %s1354_s28 = sphi %s1434_s28, %s2080_s28   ;;  %s1350_s27 = sphi %s1432_s27, %s2079_s27   ;;  %s1346_s26 = sphi %s1430_s26, %s2078_s26   ;;  %s1342_s25 = sphi %s1428_s25, %s2089_s25   ;;  %s1338_s24 = sphi %s1426_s24, %s2088_s24   ;;  %s1334_s23 = sphi %s1424_s23, %s2087_s23   ;;  %s1330_s22 = sphi %s1422_s22, %s2086_s22   ;;  %s1326_s21 = sphi %s1420_s21, %s2075_s21   ;;  %s1322_s20 = sphi %s1418_s20, %s2085_s20   ;;  %s1318_s19 = sphi %s1416_s19, %s2084_s19   ;;  %s1314_s18 = sphi %s1414_s18, %s2083_s18  }
  0x14   : > { %2021 = sst [smem:[#allocation14_spill]] %s1346_s26  ;;  %s33_s8 = sadd.s32 1, %s1358_s29 }
  0x15   : > { %2022 = sst [smem:[#allocation15_spill]] %s1350_s27  ;;  %p34_p0 = scmp.ge.s32.totalorder %s33_s8, 2 }
  0x16   : > { %2023 = sst [smem:[#allocation16_spill]] %s1354_s28  ;;  %s36_s9 = sadd.s32 1, %s1362_s30 }
  0x17   : > { %2024 = sst [smem:[#allocation17_spill]] %s1358_s29  ;;  %p2002_p1 = scmp.eq.s32.totalorder %s1366_s6, 0 }
  0x18   : > { %2025 = sst [smem:[#allocation18_spill]] %s1362_s30  ;;  %p2001_p2 = scmp.eq.s32.totalorder %s1485_s7, 0 }
  0x19   : > { %s2091_s8 = smov (%p34_p0, %s33_s8), 0  ;;  %s2093_s9 = smov (!%p34_p0, %s36_s9), %s1362_s30 }
  0x1a   : > { %2026 = sst [smem:[#allocation19_spill]] %s2091_s8  ;;  %s41_s10 = ssub.s32 %s1358_s29, %s2091_s8 }
  0x1b   : > { %s905_s11 = sshll.u32 %s1358_s29, 2  ;;  %p38_p3 = scmp.ge.s32.totalorder %s2093_s9, 2 }
  0x1c   : > { %s906_s12 = sadd.s32 4294967295, %s905_s11  ;;  %s907_s13 = sshll.u32 %s2091_s8, 2 }
  0x1d   : > { %p70_p4 = scmp.gt.s32.totalorder %s906_s12, 0  ;;  %s2095_s9 = smov (%p38_p3, %s2093_s9), 0 }
  0x1e   : > { %2027 = sst [smem:[#allocation20_spill]] %s2095_s9  ;;  %s1502_s14 = ssub.s32 %s1362_s30, %s2095_s9 }
  0x1f   : > { %s2097_s12 = smov (!%p70_p4, %s906_s12), 0  ;;  %2028 = sst [smem:[#allocation21_spill]] %s1502_s14 }
  0x20   : > { %s908_s15 = sadd.s32 4294967295, %s907_s13  ;;  %s1505_s16 = sor.u32 %s41_s10, %s1502_s14 }
  0x21   : > { %p74_p5 = scmp.gt.s32.totalorder %s908_s15, 0  ;;  %s81_s17 = sadd.s32 1, %s1334_s23 }
  0x22   : > { %p88_p7 = scmp.ne.s32.totalorder %s1334_s23, %s1330_s22  ;;  %p94_p8 = scmp.ne.s32.totalorder %s1330_s22, %s1326_s21 }
  0x23   : > { %s2099_s15 = smov (!%p74_p5, %s908_s15), 0  ;;  %s1513_s9 = sadd.s32 4, %s905_s11 }
  0x24   : > { %s77_s8 = ssub.s32 %s2097_s12, %s2099_s15  ;;  %p1518_p9 = por %p88_p7, %p2002_p1 }
  0x25   : > { %s78_s5 = sor.u32 %s77_s8, %s1502_s14  ;;  %p1524_p11 = por %p94_p8, %p2001_p2 }
  0x26   : > { %p79_p10 = scmp.eq.s32.totalorder %s78_s5, 0  ;;  %s1529_s21 = sadd.s32 4, %s907_s13 }
  0x27   : > { %s2030_s4 = scalar_select %p1524_p11, 1, 0 }
  0x28   : > { %s1532_s11 = scalar_select %p79_p10, %s1334_s23, %s81_s17  }
  0x29   : > { %2031 = sst [smem:[#allocation22_spill]] %s2030_s4  ;;  %p2000_p0 = scmp.lt.s32.totalorder %s1366_s6, 4 }
  0x2a   : > { %2032 = sst [smem:[#allocation23_spill]] %s1532_s11  ;;  %s1537_s8 = sshll.u32 %s1362_s30, 4 }
  0x2b   : > { %s254_s5 = sand.u32 1, %s1366_s6   ;;  %s256_s15 = sand.u32 1, %s1334_s23  }
  0x2c   : > { %s918_s28 = sshll.u32 %s256_s15, 4  ;;  %s921_s3 = sshll.u32 %s2097_s12, 1 }
  0x2d   : > { %s268_s27 = sadd.s32 %s921_s3, %s1537_s8  ;;  %s258_s4 = scalar_lea.vmem [#allocation5], %s918_s28 }
  0x2e   : > { %s271_s22 = sshll.u32 %s258_s4, 4  ;;  %s923_s2 = sshll.u32 %s268_s27, 7  ;;  %s1542_s22 = int_to_ptr.vmem [resolvable:$true] %s271_s22 }
  0x2f   : > { %s2033_s1 = sld [smem:[#allocation26_spill]]  ;;  %p1553_p3 = pnand %p2000_p0, %p1518_p9 }
  0x30   : > { %s1559_s3 = scalar_lea.sflag [#allocation6], %s254_s5 }
  0x31   : > { %p1124_p8 = pneg %p1553_p3 }
  0x35   : > { %s1547_s17 = scalar_lea.hbm %s2033_s1, %s923_s2  ;;  %s1127_s28 = scalar_lea.hbm %s2033_s1, 4096 }
  0x36   : > { %s1122_s4 = scalar_lea.hbm %s1547_s17, 256  ;;  %p1128_p9 = scmp.lt.u32.totalorder %s1547_s17, %s2033_s1 }
  0x37   : > { %p1123_p7 = scmp.ne.s32.totalorder %s1547_s17, %s1122_s4  ;;  %p1129_p12 = scmp.lt.u32.totalorder %s1127_s28, %s1122_s4 }
  0x38   : > { %p1131_p2 = scmp.lt.u32.totalorder %s1122_s4, %s1547_s17 }
  0x39   : > { %p1125_p10 = pnand %p1124_p8, %p1123_p7  ;;  %p1130_p0 = por %p1129_p12, %p1128_p9 }
  0x3b   : > { %p1126_p13 = pneg %p1125_p10  ;;  %p1132_p1 = por %p1131_p2, %p1130_p0 }
  0x3d   : > { %p1133_p6 = pnand %p1132_p1, %p1126_p13 }
  0x3f   : > { %1136 = shalt.err (!%p1133_p6)
}
  0x40   : > { %s1137_s10 = scalar_lea.vmem %s1542_s22, 256  ;;  %s1368_s5 = smov [#allocation5]  }
  0x41   : > { %p1138_p7 = scmp.ne.s32.totalorder %s1542_s22, %s1137_s10  ;;  %s1142_s13 = sshll.u32 %s1368_s5, 4  ;;  %s1143_s13 = int_to_ptr.vmem [resolvable:$false] %s1142_s13 }
  0x42   : > { %s1144_s2 = scalar_lea.vmem %s1143_s13, 512  ;;  %p1145_p5 = scmp.lt.s32.totalorder %s1542_s22, %s1143_s13 }
  0x43   : > { %p1140_p10 = pnand %p1138_p7, %p1124_p8  ;;  %p1146_p12 = scmp.lt.s32.totalorder %s1144_s2, %s1137_s10 }
  0x45   : > { %p1141_p4 = pneg %p1140_p10  ;;  %p1147_p9 = por %p1146_p12, %p1145_p5 }
  0x47   : > { %p1148_p2 = pnand %p1147_p9, %p1141_p4 }
  0x49   : > { %1151 = shalt.err (!%p1148_p2)
}
  0x4a   : > { %s2003_s4 = smov 128   ;;  %s2005_s27 = smov 8  }
  0x4b   : > { %985 = dma.hbm_to_vmem [thread:$0]  (!%p1553_p3), %s1547_s17, 256, %s1542_s22, %s1559_s3, %s2003_s4, %s2003_s4, %s2005_s27  }
  0x4c   : > { %p2035_p1 = scmp.lt.s32.totalorder %s1366_s6, 5  ;;  %p2036_p6 = scmp.ge.s32.totalorder %s1366_s6, 1 }
  0x4d   : > { %s904_s12 = sadd.s32 4294967294, %s1366_s6   ;;  %s45_s14 = sadd.s32 1, %s1346_s26 }
  0x4e   : > { %p1594_p13 = pnand %p2036_p6, %p2035_p1  ;;  %p2038_p0 = scmp.eq.s32.totalorder %s1505_s16, 0 }
  0x4f   : > { %p52_p4 = scmp.ne.s32.totalorder %s1346_s26, %s1342_s25  ;;  %p58_p5 = scmp.ne.s32.totalorder %s1342_s25, %s1338_s24 }
  0x50   : > { %s1603_s10 = scalar_select %p2038_p0, %s1346_s26, %s45_s14  }
  0x51   : > { %p198_p8 = scmp.eq.s32.totalorder %s1485_s7, 3  ;;  %p204_p7 = scmp.eq.s32.totalorder %s904_s12, 3 }
  0x52   : > { %2039 = sst [smem:[#allocation24_spill]] %s1603_s10  ;;  %p2040_p10 = scmp.eq.s32.totalorder %s1366_s6, 0 }
  0x53   : > { %p2042_p3 = scmp.eq.s32.totalorder %s1485_s7, 0  ;;  %p1622_p2 = por %p198_p8, %p52_p4 }
  0x54   : > { %p1612_p12 = por %p2040_p10, %p52_p4  ;;  %p1626_p1 = por %p204_p7, %p58_p5 }
  0x55   : > { %p1618_p9 = por %p2042_p3, %p58_p5  ;;  %s230_s5 = sand.u32 1, %s1346_s26  }
  0x56   : > { %s2044_s16 = scalar_select %p1622_p2, 1, 0 }
  0x57   : > { %s2043_s17 = scalar_select %p1618_p9, 1, 0 }
  0x58   : > { %s2045_s15 = scalar_select %p1626_p1, 1, 0 }
  0x59   : > { %s952_s13 = sshll.u32 %s1358_s29, 3  ;;  %s913_s2 = sshll.u32 %s230_s5, 6 }
  0x5a   : > { %s241_s12 = sadd.s32 %s952_s13, %s1537_s8  ;;  %s234_s4 = scalar_lea.vmem [#allocation2], %s913_s2 }
  0x5b   : > { %s917_s14 = sshll.u32 %s241_s12, 7  ;;  %s244_s27 = sshll.u32 %s234_s4, 4  ;;  %s1638_s27 = int_to_ptr.vmem [resolvable:$true] %s244_s27 }
  0x5c   : > { %s2046_s0 = sld [smem:[#allocation25_spill]]  ;;  %p2047_p6 = scmp.lt.s32.totalorder %s1366_s6, 4 }
  0x5d   : > { %s1648_s4 = scalar_lea.sflag [#allocation3], %s230_s5 }
  0x5e   : > { %p1644_p0 = pnand %p2047_p6, %p1612_p12 }
  0x60   : > { %p1154_p5 = pneg %p1644_p0 }
  0x62   : > { %s1636_s10 = scalar_lea.hbm %s2046_s0, %s917_s14  ;;  %s1157_s22 = scalar_lea.hbm %s2046_s0, 4096 }
  0x63   : > { %s1152_s13 = scalar_lea.hbm %s1636_s10, 1024  ;;  %p1158_p10 = scmp.lt.u32.totalorder %s1636_s10, %s2046_s0 }
  0x64   : > { %p1153_p4 = scmp.ne.s32.totalorder %s1636_s10, %s1152_s13  ;;  %p1159_p12 = scmp.lt.u32.totalorder %s1157_s22, %s1152_s13 }
  0x65   : > { %p1161_p6 = scmp.lt.u32.totalorder %s1152_s13, %s1636_s10 }
  0x66   : > { %p1155_p8 = pnand %p1154_p5, %p1153_p4  ;;  %p1160_p3 = por %p1159_p12, %p1158_p10 }
  0x68   : > { %p1156_p7 = pneg %p1155_p8  ;;  %p1162_p1 = por %p1161_p6, %p1160_p3 }
  0x6a   : > { %p1163_p2 = pnand %p1162_p1, %p1156_p7 }
  0x6c   : > { %1166 = shalt.err (!%p1163_p2)
}
  0x6d   : > { %s1167_s5 = scalar_lea.vmem %s1638_s27, 1024  ;;  %s1371_s14 = smov [#allocation2]  }
  0x6e   : > { %p1168_p4 = scmp.ne.s32.totalorder %s1638_s27, %s1167_s5  ;;  %s1172_s1 = sshll.u32 %s1371_s14, 4  ;;  %s1173_s1 = int_to_ptr.vmem [resolvable:$false] %s1172_s1 }
  0x6f   : > { %s1174_s30 = scalar_lea.vmem %s1173_s1, 2048  ;;  %p1175_p9 = scmp.lt.s32.totalorder %s1638_s27, %s1173_s1 }
  0x70   : > { %p1170_p8 = pnand %p1168_p4, %p1154_p5  ;;  %p1176_p10 = scmp.lt.s32.totalorder %s1174_s30, %s1167_s5 }
  0x72   : > { %p1171_p11 = pneg %p1170_p8  ;;  %p1177_p12 = por %p1176_p10, %p1175_p9 }
  0x74   : > { %p1178_p3 = pnand %p1177_p12, %p1171_p11 }
  0x76   : > { %1181 = shalt.err (!%p1178_p3)
}
  0x77   : > { %s2049_s13 = smov 8   ;;  %s2050_s22 = smov 128  }
  0x78   : > { %s2051_s2 = sld [smem:[#allocation21_spill]]  ;;  %p2052_p11 = scmp.lt.s32.totalorder %s1513_s9, 7 }
  0x79   : > { %982 = dma.hbm_to_vmem [thread:$0]  (!%p1644_p0), %s1636_s10, 1024, %s1638_s27, %s1648_s4, %s2050_s22, %s2050_s22, %s2049_s13  }
  0x7a   : > { %s2101_s9 = smov (!%p2052_p11, %s1513_s9), 7  ;;  %p2053_p9 = scmp.lt.s32.totalorder %s1529_s21, 7 }
  0x7b   : > { %s117_s29 = sadd.s32 1, %s1322_s20  ;;  %p124_p2 = scmp.ne.s32.totalorder %s1322_s20, %s1318_s19 }
  0x7c   : > { %s2103_s21 = smov (!%p2053_p9, %s1529_s21), 7  ;;  %p130_p1 = scmp.ne.s32.totalorder %s1318_s19, %s1314_s18 }
  0x7d   : > { %s113_s12 = ssub.s32 %s2101_s9, %s2103_s21  ;;  %p2054_p5 = scmp.eq.s32.totalorder %s1366_s6, 0 }
  0x7e   : > { %s114_s5 = sor.u32 %s113_s12, %s2051_s2  ;;  %p2056_p4 = scmp.eq.s32.totalorder %s1485_s7, 0 }
  0x7f   : > { %p1693_p7 = por %p124_p2, %p2054_p5  ;;  %p115_p6 = scmp.eq.s32.totalorder %s114_s5, 0 }
  0x80   : > { %p1699_p8 = por %p130_p1, %p2056_p4  ;;  %s283_s10 = sand.u32 1, %s1322_s20  }
  0x81   : > { %s926_s4 = sshll.u32 %s2101_s9, 1  ;;  %s924_s21 = sshll.u32 %s283_s10, 4 }
  0x82   : > { %s2057_s27 = scalar_select %p1699_p8, 1, 0 }
  0x83   : > { %s1705_s1 = scalar_select %p115_p6, %s1322_s20, %s117_s29  }
  0x84   : > { %s295_s30 = sadd.s32 %s926_s4, %s1537_s8  ;;  %s2058_s0 = sld [smem:[#allocation27_spill]] }
  0x85   : > { %s928_s18 = sshll.u32 %s295_s30, 7  ;;  %s285_s5 = scalar_lea.vmem [#allocation7], %s924_s21 }
  0x86   : > { %s298_s11 = sshll.u32 %s285_s5, 4  ;;  %p2059_p0 = scmp.lt.s32.totalorder %s1366_s6, 4  ;;  %s1713_s11 = int_to_ptr.vmem [resolvable:$true] %s298_s11 }
  0x88   : > { %p1719_p10 = pnand %p2059_p0, %p1693_p7 }
  0x8a   : > { %s1711_s26 = scalar_lea.hbm %s2058_s0, %s928_s18  ;;  %p1184_p3 = pneg %p1719_p10 }
  0x8b   : > { %s1182_s8 = scalar_lea.hbm %s1711_s26, 256  ;;  %s1187_s4 = scalar_lea.hbm %s2058_s0, 4096 }
  0x8c   : > { %p1183_p12 = scmp.ne.s32.totalorder %s1711_s26, %s1182_s8  ;;  %p1188_p2 = scmp.lt.u32.totalorder %s1711_s26, %s2058_s0 }
  0x8d   : > { %p1189_p1 = scmp.lt.u32.totalorder %s1187_s4, %s1182_s8  ;;  %p1191_p7 = scmp.lt.u32.totalorder %s1182_s8, %s1711_s26 }
  0x8e   : > { %p1185_p11 = pnand %p1184_p3, %p1183_p12 }
  0x8f   : > { %p1190_p5 = por %p1189_p1, %p1188_p2 }
  0x90   : > { %p1186_p9 = pneg %p1185_p11 }
  0x91   : > { %p1192_p6 = por %p1191_p7, %p1190_p5 }
  0x93   : > { %p1193_p4 = pnand %p1192_p6, %p1186_p9 }
  0x95   : > { %1196 = shalt.err (!%p1193_p4)
}
  0x96   : > { %s1197_s30 = scalar_lea.vmem %s1713_s11, 256  ;;  %s1372_s18 = smov [#allocation7]  }
  0x97   : > { %p1198_p0 = scmp.ne.s32.totalorder %s1713_s11, %s1197_s30  ;;  %s1202_s2 = sshll.u32 %s1372_s18, 4  ;;  %s1203_s2 = int_to_ptr.vmem [resolvable:$false] %s1202_s2 }
  0x98   : > { %s1204_s12 = scalar_lea.vmem %s1203_s2, 512  ;;  %p1205_p8 = scmp.lt.s32.totalorder %s1713_s11, %s1203_s2 }
  0x99   : > { %p1200_p12 = pnand %p1198_p0, %p1184_p3  ;;  %p1206_p2 = scmp.lt.s32.totalorder %s1204_s12, %s1197_s30 }
  0x9b   : > { %p1201_p11 = pneg %p1200_p12  ;;  %p1207_p1 = por %p1206_p2, %p1205_p8 }
  0x9d   : > { %p1208_p5 = pnand %p1207_p1, %p1201_p11 }
  0x9f   : > { %1211 = shalt.err (!%p1208_p5)
}
  0xa0   : > { %988 = dma.hbm_to_vmem [thread:$0]  (!%p1719_p10), %s1711_s26, 256, %s1713_s11, %s1559_s3, %s2050_s22, %s2050_s22, %s2049_s13  }
  0xa1   : > { %310 = sbr.rel (%p1594_p13) target bundleno = 719 (0x2cf), region = 40  ;;  %s1755_s5 = sand.u32 (!%p1594_p13), 1, %s1342_s25  }
  0xa2   : > { %s930_s8 = sshll.u32 (!%p1594_p13), %s1755_s5, 6  ;;  %s313_s29 = scalar_lea.sflag (!%p1594_p13), [#allocation3], %s1755_s5 }
  0xa3   : > { %s316_s10 = scalar_lea.vmem (!%p1594_p13), [#allocation2], %s930_s8  ;;  %p2061_p8 = scmp.ne.s32.totalorder (!%p1594_p13), %s2043_s17, 0 }
  0xa8   : > { %1297 = dma.done.wait (%p2061_p8), %s313_s29, 1024  }
  0xa9   : > { %1299 = vsyncadd (%p2061_p8), %s313_s29, 4294966272  ;;  %s2062_s9 = sld [smem:[#allocation13_spill]]  ;;  %s2063_s26 = sld [smem:[#allocation22_spill]] }
  0xaa   : > { %s321_s11 = sand.u32 1, %s1485_s7  }
  0xab   : > { %s322_s13 = scalar_lea.sflag [#allocation6], %s321_s11 }
  0xaf   : > { %s323_s3 = sand.u32 1, %s2062_s9   ;;  %p2064_p13 = scmp.ne.s32.totalorder %s2063_s26, 0 }
  0xb0   : > { %s931_s28 = sshll.u32 %s323_s3, 4 }
  0xb1   : > { %s325_s22 = scalar_lea.vmem [#allocation5], %s931_s28 }
  0xb2   : > { %1301 = dma.done.wait (%p2064_p13), %s322_s13, 256  }
  0xb3   : > { %1303 = vsyncadd (%p2064_p13), %s322_s13, 4294967040  ;;  %s332_s4 = sand.u32 1, %s1318_s19   ;;  %p2065_p10 = scmp.ne.s32.totalorder %s2057_s27, 0 }
  0xb4   : > { %s932_s14 = sshll.u32 %s332_s4, 4 }
  0xb5   : > { %s334_s21 = scalar_lea.vmem [#allocation7], %s932_s14 }
  0xb6   : > { %1305 = dma.done.wait (%p2065_p10), %s322_s13, 256  }
  0xb7   : > { %1307 = vsyncadd (%p2065_p10), %s322_s13, 4294967040  ;;  %v415_v0 = vld [vmem:[%s325_s22] sm:$0xff]  ;;  %v416_v1 = vld [vmem:[%s325_s22 + $0x8] sm:$0xff]  ;;  %s2066_s7 = sld [smem:[#allocation15_spill]]  ;;  %s1373_s17 = smov 124   ;;  %v440_v22 = vlaneseq  ;;  %vm691_vm4 = vcmask 1041408  }
  0xb8   : > { %v384_v2 = vld [vmem:[%s316_s10 + $0x10] sm:$0xff]  ;;  %v417_v3 = vadd.f32 %v416_v1, %v415_v0  ;;  %v385_v4 = vld [vmem:[%s316_s10 + $0x18] sm:$0xff]  ;;  %v382_v5 = vld [vmem:[%s316_s10] sm:$0xff]  ;;  %s1374_s30 = smov 4   ;;  %s1375_s18 = smov 16   ;;  %vm571_vm5 = vcmask 31744  }
  0xb9   : > { %v383_v6 = vld [vmem:[%s316_s10 + $0x8] sm:$0xff]  ;;  %v391_v7 = vadd.f32 %v385_v4, %v384_v2  ;;  %v386_v8 = vld [vmem:[%s316_s10 + $0x20] sm:$0xff]  ;;  %v388_v11 = vld [vmem:[%s316_s10 + $0x30] sm:$0xff]  ;;  %v1781_v29 = vshrl.u32 %v440_v22, 7  ;;  %s1376_s12 = smov 28   ;;  %s1377_s8 = smov 8  }
  0xba   : > { %v387_v9 = vld [vmem:[%s316_s10 + $0x28] sm:$0xff]  ;;  %419 = vrot.lane.b32.xlu0 %v417_v3, %s1373_s17  ;;  %v390_v10 = vadd.f32 %v383_v6, %v382_v5  ;;  %v389_v12 = vld [vmem:[%s316_s10 + $0x38] sm:$0xff]  ;;  %v428_v13 = vld [vmem:[%s334_s21] sm:$0xff]  ;;  %s1378_s29 = smov 12   ;;  %s1379_s10 = smov 20   ;;  %vm584_vm6 = vcmask 64512  }
  0xbb   : > { %400 = vrot.lane.b32.xlu1 %v391_v7, %s1373_s17  ;;  %v392_v14 = vadd.f32 %v387_v9, %v386_v8  ;;  %v429_v15 = vld [vmem:[%s334_s21 + $0x8] sm:$0xff]  ;;  %v393_v16 = vadd.f32 %v389_v12, %v388_v11  ;;  %vm442_vm1 = vcmp.eq.s32.totalorder %v1781_v29, 0  ;;  %vm457_vm3 = vcmp.eq.s32.totalorder %v1781_v29, 7  ;;  %s2067_s11 = sld [smem:[#allocation28_spill]]  ;;  %s1380_s3 = smov 24  }
  0xbc   : > { %v430_v17 = vadd.f32 %v429_v15, %v428_v13  ;;  %s1381_s14 = smov 32   ;;  %vm593_vm7 = vcmask 97280   ;;  %vm602_vm8 = vcmask 130048   ;;  %vm611_vm9 = vcmask 162816   ;;  %s2068_s21 = sld [smem:[#allocation16_spill]] }
  0xbd   : > { %p414_p3 = scmp.eq.s32.totalorder %s2066_s7, 0  ;;  %p427_p9 = scmp.eq.s32.totalorder %s2066_s7, 1  ;;  %vm620_vm10 = vcmask 195584   ;;  %vm629_vm11 = vcmask 228352   ;;  %vm638_vm12 = vcmask 261120   ;;  %vm684_vm13 = vcmask 293888  }
  0xbe   : > { %398 = vrot.lane.b32.xlu0 %v390_v10, %s1373_s17  ;;  %s2070_s28 = sld [smem:[#allocation30_spill]]  ;;  %s749_s4 = scalar_lea.sflag [#allocation4], %s1755_s5 }
  0xbf   : > { %402 = vrot.lane.b32.xlu1 %v392_v14, %s1373_s17  ;;  %s423_s27 = scalar_select %p414_p3, 1, 0 }
  0xc0   : > { %s436_s2 = scalar_select %p427_p9, 1, 0 }
  0xc1   : > { %v424_v18 = vstv %s423_s27  ;;  %v1120_v6 = vld [vmem:[%s2067_s11 + $0x8] sm:$0xff]   ;;  %v1121_v8 = vld [vmem:[%s2067_s11 + $0x10] ss:$0 sps:$4 sm:$0x33]   ;;  %p2072_p6 = scmp.ne.s32.totalorder %s2044_s16, 0 }
  0xc2   : > { %404 = vrot.lane.b32.xlu0 %v393_v16, %s1373_s17  ;;  %vm425_vm0 = vcmp.eq.s32.totalorder %v424_v18, 1  ;;  %v437_v38 = vstv %s436_s2  ;;  %v693_v11 = vsel %vm691_vm4, %v1121_v8, 0  ;;  %s944_s27 = sshll.u32 %s2068_s21, 3  ;;  %s1382_s21 = smov [#allocation8]  }
  0xc3   : > { %432 = vrot.lane.b32.xlu1 %v430_v17, %s1373_s17  ;;  %vm438_vm2 = vcmp.eq.s32.totalorder %v437_v38, 1  ;;  %s943_s17 = sshll.u32 %s2066_s7, 2 }
  0xc4   : > { %s2071_s13 = smov %s2070_s28 }
 0x12c   : > { %v420_v19 = vpop.permute.xlu0 %419 }
 0x12d   : > { %v422_v20 = vadd.f32 %v420_v19, %v417_v3  ;;  %v401_v21 = vpop.permute.xlu1 %400  ;;  %v1119_v3 = vld [vmem:[%s2067_s11] sm:$0xff]  }
 0x12e   : > { %v1775_v23 = vadd.f32 %v401_v21, %v391_v7  ;;  %960 = vmatprep.subr.bf16.mxu0 %v1119_v3 }
 0x12f   : > { %v1777_v25 = vsel %vm425_vm0, 0.0, %v422_v20  ;;  %961 = vmatpush3.bf16.msra.mxu0 %v1119_v3 }
 0x130   : > { %v399_v24 = vpop.permute.xlu0 %398  ;;  %v480_v27 = vpack.c.bf16 %v1775_v23, %v1775_v23  ;;  %v443_v32 = vrot.slane %v1777_v25, 7  ;;  %v460_v41 = vrot.slane %v1775_v23, 1  ;;  %v478_v44 = vpack.c.bf16 %v1777_v25, %v1777_v25  ;;  %962 = vmatprep.subr.bf16.mxu0 %v1120_v6 }
 0x131   : > { %v410_v26 = vadd.f32 %v399_v24, %v390_v10  ;;  %v403_v28 = vpop.permute.xlu1 %402  ;;  %v445_v54 = vrot.slane %v1775_v23, 7  ;;  %v458_v4 = vrot.slane %v1777_v25, 1 }
 0x132   : > { %v412_v30 = vadd.f32 %v403_v28, %v392_v14  ;;  %498 = vrot.lane.b32.xlu0 %v480_v27, %s1374_s30  ;;  %v1790_v35 = vsel %vm442_vm1, 0.0, %v443_v32  ;;  %v468_v47 = vsel %vm457_vm3, 0.0, %v460_v41 }
 0x133   : > { %v479_v31 = vpack.c.bf16 %v410_v26, %v410_v26  ;;  %v459_v43 = vrot.slane %v410_v26, 1  ;;  %v444_v46 = vrot.slane %v410_v26, 7  ;;  %v486_v50 = vpack.c.bf16 %v468_v47, %v468_v47  ;;  %963 = vmatpush3.bf16.msra.mxu0 %v1120_v6 }
 0x134   : > { %v481_v33 = vpack.c.bf16 %v412_v30, %v412_v30  ;;  %v405_v34 = vpop.permute.xlu0 %404  ;;  %v461_v48 = vrot.slane %v412_v30, 1  ;;  %v446_v51 = vrot.slane %v412_v30, 7  ;;  %v453_v60 = vsel %vm442_vm1, 0.0, %v445_v54  ;;  %970 = vmatprep.subr.msk.bf16.mxu0 %vm691_vm4, %v1121_v8 }
 0x135   : > { %496 = vrot.lane.b32.xlu1 %v479_v31, %s1374_s30  ;;  %v413_v36 = vadd.f32 %v405_v34, %v393_v16  ;;  %v433_v37 = vpop.permute.xlu1 %432  ;;  %v467_v49 = vsel %vm457_vm3, 0.0, %v459_v43  ;;  %v452_v52 = vsel %vm442_vm1, 0.0, %v444_v46  ;;  %v1824_v62 = vpack.c.bf16 %v453_v60, %v453_v60 }
 0x136   : > { %527 = vrot.lane.b32.xlu0 %v479_v31, %s1375_s18  ;;  %v435_v40 = vadd.f32 %v433_v37, %v430_v17  ;;  %v485_v53 = vpack.c.bf16 %v467_v49, %v467_v49  ;;  %v469_v55 = vsel %vm457_vm3, 0.0, %v461_v48  ;;  %v1812_v56 = vpack.c.bf16 %v452_v52, %v452_v52 }
 0x137   : > { %v482_v39 = vpack.c.bf16 %v413_v36, %v413_v36  ;;  %v454_v57 = vsel %vm442_vm1, 0.0, %v446_v51  ;;  %v487_v58 = vpack.c.bf16 %v469_v55, %v469_v55  ;;  %v447_v59 = vrot.slane %v413_v36, 7  ;;  %965 = vmatpush3.bf16.msra.mxu0 %v693_v11 }
 0x138   : > { %v1794_v42 = vsel %vm438_vm2, 0.0, %v435_v40  ;;  %v1820_v61 = vpack.c.bf16 %v454_v57, %v454_v57  ;;  %v462_v1 = vrot.slane %v413_v36, 1  ;;  %v466_v7 = vsel %vm457_vm3, 0.0, %v458_v4 }
 0x139   : > { %500 = vrot.lane.b32.xlu1 %v481_v33, %s1374_s30  ;;  %v483_v45 = vpack.c.bf16 %v1794_v42, %v1794_v42  ;;  %v455_v63 = vsel %vm442_vm1, 0.0, %v447_v59  ;;  %v448_v9 = vrot.slane %v1794_v42, 7  ;;  %v484_v10 = vpack.c.bf16 %v466_v7, %v466_v7 }
 0x13a   : > { %531 = vrot.lane.b32.xlu0 %v481_v33, %s1375_s18  ;;  %v476_v0 = vpack.c.bf16 %v455_v63, %v455_v63  ;;  %v470_v2 = vsel %vm457_vm3, 0.0, %v462_v1  ;;  %v463_v12 = vrot.slane %v1794_v42, 1 }
 0x13b   : > { %v488_v5 = vpack.c.bf16 %v470_v2, %v470_v2  ;;  %v456_v13 = vsel %vm442_vm1, 0.0, %v448_v9 }
 0x13c   : > { %v477_v14 = vpack.c.bf16 %v456_v13, %v456_v13  ;;  %v471_v15 = vsel %vm457_vm3, 0.0, %v463_v12 }
 0x13d   : > { %529 = vrot.lane.b32.xlu1 %v480_v27, %s1375_s18  ;;  %v489_v16 = vpack.c.bf16 %v471_v15, %v471_v15 }
 0x13e   : > { %554 = vrot.lane.b32.xlu0 %v480_v27, %s1376_s12 }
 0x141   : > { %533 = vrot.lane.b32.xlu1 %v482_v39, %s1375_s18 }
 0x142   : > { %558 = vrot.lane.b32.xlu0 %v482_v39, %s1376_s12 }
 0x145   : > { %556 = vrot.lane.b32.xlu1 %v481_v33, %s1376_s12 }
 0x146   : > { %494 = vrot.lane.b32.xlu0 %v478_v44, %s1374_s30  ;;  %s933_s30 = sshll.u32 %s1755_s5, 5 }
 0x149   : > { %560 = vrot.lane.b32.xlu1 %v483_v45, %s1376_s12  ;;  %v472_v45 = vpack.c.bf16 %v1790_v35, %v1790_v35  ;;  %s2069_s12 = sld [smem:[#allocation29_spill]] }
 0x14a   : > { %510 = vrot.lane.b32.xlu0 %v486_v50, %s1377_s8 }
 0x14d   : > { %508 = vrot.lane.b32.xlu1 %v485_v53, %s1377_s8 }
 0x14e   : > { %518 = vrot.lane.b32.xlu0 %v1812_v56, %s1378_s29 }
 0x151   : > { %512 = vrot.lane.b32.xlu1 %v487_v58, %s1377_s8 }
 0x152   : > { %522 = vrot.lane.b32.xlu0 %v1820_v61, %s1378_s29 }
 0x155   : > { %520 = vrot.lane.b32.xlu1 %v1824_v62, %s1378_s29 }
 0x156   : > { %536 = vrot.lane.b32.xlu0 %v485_v53, %s1379_s10 }
 0x159   : > { %524 = vrot.lane.b32.xlu1 %v476_v0, %s1378_s29  ;;  %s761_s29 = sadd.s32 %s944_s27, %s943_s17  ;;  %s1216_s17 = sshll.u32 %s1382_s21, 4  ;;  %s1217_s17 = int_to_ptr.vmem [resolvable:$false] %s1216_s17 }
 0x15a   : > { %540 = vrot.lane.b32.xlu0 %v487_v58, %s1379_s10  ;;  %s945_s26 = sshll.u32 %s761_s29, 7  ;;  %s1218_s27 = scalar_lea.vmem %s1217_s17, 1024 }
 0x15b   : > { %s1903_s22 = scalar_lea.hbm %s2070_s28, %s945_s26 }
 0x15d   : > { %538 = vrot.lane.b32.xlu1 %v486_v50, %s1379_s10 }
 0x15e   : > { %545 = vrot.lane.b32.xlu0 %v1824_v62, %s1380_s3 }
 0x161   : > { %542 = vrot.lane.b32.xlu1 %v488_v5, %s1379_s10  ;;  %s370_s10 = scalar_lea.vmem [#allocation8], %s933_s30 }
 0x162   : > { %549 = vrot.lane.b32.xlu0 %v476_v0, %s1380_s3  ;;  %s764_s9 = sshll.u32 %s370_s10, 4  ;;  %s1897_s9 = int_to_ptr.vmem [resolvable:$true] %s764_s9 }
 0x163   : > { %p1219_p12 = scmp.lt.s32.totalorder %s1897_s9, %s1217_s17 }
 0x165   : > { %547 = vrot.lane.b32.xlu1 %v1820_v61, %s1380_s3 }
 0x166   : > { %506 = vrot.lane.b32.xlu0 %v484_v10, %s1377_s8 }
 0x169   : > { %565 = vrot.lane.b32.xlu1 %v487_v58, %s1381_s14 }
 0x16a   : > { %563 = vrot.lane.b32.xlu0 %v486_v50, %s1381_s14 }
 0x16d   : > { %551 = vrot.lane.b32.xlu1 %v477_v14, %s1380_s3 }
 0x16e   : > { %567 = vrot.lane.b32.xlu0 %v488_v5, %s1381_s14 }
 0x171   : > { %569 = vrot.lane.b32.xlu1 %v489_v16, %s1381_s14  ;;  %s1212_s14 = scalar_lea.vmem %s1897_s9, 512 }
 0x172   : > { %p1213_p7 = scmp.ne.s32.totalorder %s1897_s9, %s1212_s14  ;;  %p1220_p11 = scmp.lt.s32.totalorder %s1218_s27, %s1212_s14 }
 0x174   : > { %p1214_p4 = pnand %p1213_p7, %p2072_p6  ;;  %p1221_p2 = por %p1220_p11, %p1219_p12 }
 0x176   : > { %p1215_p0 = pneg %p1214_p4 }
 0x178   : > { %p1222_p1 = pnand %p1221_p2, %p1215_p0 }
 0x1a4   : > { %v499_v17 = vpop.permute.xlu0 %498 }
 0x1a5   : > { %v580_v48 = vsel %vm571_vm5, %v1824_v62, %v499_v17 }
 0x1a7   : > { %v497_v18 = vpop.permute.xlu1 %496 }
 0x1a8   : > { %v528_v19 = vpop.permute.xlu0 %527  ;;  %v577_v42 = vsel %vm571_vm5, %v1812_v56, %v497_v18 }
 0x1ab   : > { %v501_v20 = vpop.permute.xlu1 %500 }
 0x1ac   : > { %v532_v21 = vpop.permute.xlu0 %531  ;;  %v583_v49 = vsel %vm571_vm5, %v1820_v61, %v501_v20  ;;  %v934_v20 = vld [vmem:[%s2069_s12] ss:$0 sm:$0xff] }
 0x1af   : > { %v530_v22 = vpop.permute.xlu1 %529 }
 0x1b0   : > { %v555_v23 = vpop.permute.xlu0 %554 }
 0x1b3   : > { %v534_v24 = vpop.permute.xlu1 %533 }
 0x1b4   : > { %v1852_v25 = vpop.permute.xlu0 %558 }
 0x1b7   : > { %v557_v26 = vpop.permute.xlu1 %556 }
 0x1b8   : > { %v495_v27 = vpop.permute.xlu0 %494 }
 0x1b9   : > { %v574_v50 = vsel %vm571_vm5, %v472_v45, %v495_v27 }
 0x1bb   : > { %v561_v28 = vpop.permute.xlu1 %560 }
 0x1bc   : > { %v511_v30 = vpop.permute.xlu0 %510 }
 0x1bd   : > { %v590_v52 = vsel %vm584_vm6, %v580_v48, %v511_v30 }
 0x1bf   : > { %v509_v29 = vpop.permute.xlu1 %508 }
 0x1c0   : > { %v519_v31 = vpop.permute.xlu0 %518  ;;  %v588_v44 = vsel %vm584_vm6, %v577_v42, %v509_v29 }
 0x1c3   : > { %v513_v32 = vpop.permute.xlu1 %512 }
 0x1c4   : > { %v523_v33 = vpop.permute.xlu0 %522  ;;  %v592_v53 = vsel %vm584_vm6, %v583_v49, %v513_v32 }
 0x1c5   : > { %v599_v55 = vsel %vm593_vm7, %v590_v52, %v523_v33 }
 0x1c6   : > { %v608_v0 = vsel %vm602_vm8, %v599_v55, %v532_v21 }
 0x1c7   : > { %v521_v34 = vpop.permute.xlu1 %520 }
 0x1c8   : > { %v537_v36 = vpop.permute.xlu0 %536  ;;  %v597_v46 = vsel %vm593_vm7, %v588_v44, %v521_v34 }
 0x1c9   : > { %v606_v54 = vsel %vm602_vm8, %v597_v46, %v530_v22 }
 0x1cb   : > { %v525_v37 = vpop.permute.xlu1 %524 }
 0x1cc   : > { %v541_v38 = vpop.permute.xlu0 %540  ;;  %v601_v56 = vsel %vm593_vm7, %v592_v53, %v525_v37 }
 0x1cd   : > { %v610_v1 = vsel %vm602_vm8, %v601_v56, %v534_v24  ;;  %v617_v3 = vsel %vm611_vm9, %v608_v0, %v541_v38 }
 0x1cf   : > { %v539_v39 = vpop.permute.xlu1 %538 }
 0x1d0   : > { %v546_v40 = vpop.permute.xlu0 %545  ;;  %v615_v57 = vsel %vm611_vm9, %v606_v54, %v539_v39 }
 0x1d3   : > { %v543_v41 = vpop.permute.xlu1 %542 }
 0x1d4   : > { %v550_v43 = vpop.permute.xlu0 %549  ;;  %v619_v4 = vsel %vm611_vm9, %v610_v1, %v543_v41 }
 0x1d5   : > { %v626_v8 = vsel %vm620_vm10, %v617_v3, %v550_v43 }
 0x1d6   : > { %v635_v14 = vsel %vm629_vm11, %v626_v8, %v1852_v25 }
 0x1d7   : > { %v548_v47 = vpop.permute.xlu1 %547 }
 0x1d8   : > { %v507_v51 = vpop.permute.xlu0 %506  ;;  %v624_v60 = vsel %vm620_vm10, %v615_v57, %v548_v47 }
 0x1d9   : > { %v586_v35 = vsel %vm584_vm6, %v574_v50, %v507_v51  ;;  %v633_v5 = vsel %vm629_vm11, %v624_v60, %v557_v26 }
 0x1da   : > { %v595_v58 = vsel %vm593_vm7, %v586_v35, %v519_v31 }
 0x1db   : > { %v566_v59 = vpop.permute.xlu1 %565  ;;  %v604_v61 = vsel %vm602_vm8, %v595_v58, %v528_v19 }
 0x1dc   : > { %v613_v62 = vsel %vm611_vm9, %v604_v61, %v537_v36  ;;  %v564_v63 = vpop.permute.xlu0 %563  ;;  %v642_v9 = vsel %vm638_vm12, %v633_v5, %v566_v59 }
 0x1dd   : > { %v622_v2 = vsel %vm620_vm10, %v613_v62, %v546_v40 }
 0x1de   : > { %v631_v6 = vsel %vm629_vm11, %v622_v2, %v555_v23 }
 0x1df   : > { %v552_v7 = vpop.permute.xlu1 %551  ;;  %v640_v10 = vsel %vm638_vm12, %v631_v6, %v564_v63 }
 0x1e0   : > { %v628_v11 = vsel %vm620_vm10, %v619_v4, %v552_v7  ;;  %v568_v12 = vpop.permute.xlu0 %567  ;;  %v935_v13 = vcombine.low %v640_v10, %v642_v9 }
 0x1e1   : > { %v637_v15 = vsel %vm629_vm11, %v628_v11, %v561_v28  ;;  %v644_v17 = vsel %vm638_vm12, %v635_v14, %v568_v12 }
 0x1e2   : > { %966 = vmatprep.mubr.msk.bf16.mxu0 %vm684_vm13, %v935_v13 }
 0x1e3   : > { %v570_v16 = vpop.permute.xlu1 %569 }
 0x1e4   : > { %v646_v18 = vsel %vm638_vm12, %v637_v15, %v570_v16 }
 0x1e5   : > { %v936_v19 = vcombine.low %v644_v17, %v646_v18 }
 0x1e7   : > { %967 = vmatmul.mubr.msk.bf16.vlgmr.msra.gmra.mrb[0].mxu0 %vm684_vm13, %v936_v19 }
 0x2ba   : > { %v968_v21 = vpop.f32.mrb[0].mxu0 }
 0x2bb   : > { %v738_v22 = vadd.f32 %v968_v21, %v934_v20  ;;  %v729_v23 = vpop.f32.mrb[1].mxu0 }
 0x2bc   : > { %v730_v24 = vadd.f32 %v934_v20, %v729_v23  ;;  %v969_v25 = vpop.f32.mrb[2].mxu0 }
 0x2bd   : > { %746 = vst.msk [vmem:[%s370_s10 + $0x10] sm:$0xff] %vm584_vm6, %v738_v22  ;;  %v741_v26 = vadd.f32 %v969_v25, %v934_v20  ;;  %v732_v27 = vpop.f32.mrb[3].mxu0 }
 0x2be   : > { %744 = vst.msk [vmem:[%s370_s10] sm:$0xff] %vm584_vm6, %v730_v24  ;;  %v733_v28 = vadd.f32 %v934_v20, %v732_v27 }
 0x2bf   : > { %747 = vst.msk [vmem:[%s370_s10 + $0x18] sm:$0xff] %vm584_vm6, %v741_v26 }
 0x2c0   : > { %745 = vst.msk [vmem:[%s370_s10 + $0x8] sm:$0xff] %vm584_vm6, %v733_v28 }
 0x2c1   : > { %1225 = shalt.err (!%p1222_p1)
}
 0x2c2   : > { %s1226_s30 = scalar_lea.hbm %s1903_s22, 512  ;;  %s1230_s12 = scalar_lea.hbm %s2071_s13, 2048 }
 0x2c3   : > { %p1227_p5 = scmp.ne.s32.totalorder %s1903_s22, %s1226_s30  ;;  %p1231_p10 = scmp.lt.u32.totalorder %s1903_s22, %s2071_s13 }
 0x2c4   : > { %p1232_p3 = scmp.lt.u32.totalorder %s1230_s12, %s1226_s30  ;;  %p1234_p7 = scmp.lt.u32.totalorder %s1226_s30, %s1903_s22 }
 0x2c5   : > { %p1228_p8 = pnand %p1227_p5, %p2072_p6 }
 0x2c6   : > { %p1233_p9 = por %p1232_p3, %p1231_p10 }
 0x2c7   : > { %p1229_p13 = pneg %p1228_p8 }
 0x2c8   : > { %p1235_p4 = por %p1234_p7, %p1233_p9 }
 0x2ca   : > { %p1236_p0 = pnand %p1235_p4, %p1229_p13 }
 0x2cc   : > { %1239 = shalt.err (!%p1236_p0)
}
 0x2cd   : > { %s1383_s26 = smov 128  }
 0x2ce   : > { %977 = dma.vmem_to_hbm [thread:$0]  (%p2072_p6), %s1897_s9, 512, %s1903_s22, %s749_s4, %s1383_s26, %s1383_s26, %s1377_s8  }
 0x2cf PF: > { %p994_p12 = scmp.ge.s32.totalorder %s1366_s6, 2  ;;  %s779_s7 = sand.u32 1, %s1338_s24  }
 0x2d0   : > { %p2073_p11 = scmp.ne.s32.totalorder %s2045_s15, 0  ;;  %s780_s3 = scalar_lea.sflag [#allocation4], %s779_s7 }
 0x2d2   : > { %p990_p2 = pnand %p994_p12, %p2073_p11 }
 0x2d4   : > { %1309 = dma.done.wait (!%p990_p2), %s780_s3, 512  }
 0x2d5   : > { %1311 = vsyncadd (!%p990_p2), %s780_s3, 4294966784  ;;  %s24_s6 = sadd.s32 1, %s1366_s6   ;;  %s2075_s21 = sld [smem:[#allocation13_spill]] }
 0x2d6   : > { %p1937_p1 = scmp.ge.s32.totalorder %s24_s6, 6   ;;  %s2076_s5 = sld [smem:[#allocation23_spill]] }
 0x2d7   : > { %s2077_s8 = sld [smem:[#allocation14_spill]]  ;;  %s2078_s26 = sld [smem:[#allocation24_spill]] }
 0x2d8   : > { %s2079_s27 = sld [smem:[#allocation17_spill]]  ;;  %s2080_s28 = sld [smem:[#allocation18_spill]] }
 0x2d9   : > { %s2081_s29 = sld [smem:[#allocation19_spill]]  ;;  %s2082_s30 = sld [smem:[#allocation20_spill]] }
 0x2da   : > { %s2083_s18 = smov %s1318_s19  ;;  %s2084_s19 = smov %s1322_s20 }
 0x2db   : > { %s2085_s20 = smov %s1705_s1  ;;  %s2086_s22 = smov %s1334_s23 }
 0x2dc   : > { %s2087_s23 = smov %s2076_s5  ;;  %s2088_s24 = smov %s1342_s25 }
 0x2dd   : > { %s2089_s25 = smov %s2077_s8  ;;  %23 = sbr.rel (!%p1937_p1) target bundleno = 19 (0x13), region = 109 }
 0x2e4   :  { %785 = vsyncpa [#allocation3], 1 }
 0x2e5   :  { %787 = vsyncpa [#allocation3 + $0x1], 1 }
 0x2e6   :  { %788 = vsyncpa [#allocation6], 1 }
 0x2e7   :  { %790 = vsyncpa [#allocation6 + $0x1], 1 }
 0x2e8   :  { %791 = vsyncpa [#allocation4], 1 }
 0x2e9   :  { %793 = vsyncpa [#allocation4 + $0x1], 1 }

</bundles_post_ra>
